<compile_context>
chip_gen: v6e
topology: v6e:2x2x1
jax: 0.10.0
libtpu: 0.0.40
codegen_flags: <defaults>
</compile_context>

<pallas_src>
import math
from functools import partial

import jax
import jax.numpy as jnp
from jax.experimental import pallas as pl
from jax.experimental.pallas import tpu as pltpu


# ---------------------------------------------------------------------------
# helpers
# ---------------------------------------------------------------------------
def _round_up(n, m):
    return ((n + m - 1) // m) * m


def _pad_rows(a, rows):
    pad = rows - a.shape[0]
    if pad == 0:
        return a
    return jnp.pad(a, ((0, pad),) + ((0, 0),) * (a.ndim - 1))


def _pick_tile(n_rows, bytes_per_row, resident_bytes=0, *, max_tile=1024,
               vmem_budget=20 << 20):
    """Largest row tile keeping (double-buffered streams + resident weights) in budget,
    rounded to 16 rows (bf16 sublane packing) and split so the grid has >=2 steps
    (both v7x TensorCores get work)."""
    tile = min(max_tile, _round_up(max(n_rows, 16), 16))
    while tile > 16 and resident_bytes + 2 * tile * bytes_per_row > vmem_budget:
        tile = max(16, _round_up(tile // 2, 16))
    if n_rows >= 32:
        tile = min(tile, _round_up((n_rows + 1) // 2, 16))
    return max(_round_up(tile, 16), 16)


_VMEM_LIMIT = 32 * 1024 * 1024


# ---------------------------------------------------------------------------
# Pallas kernel 1: fused typed linear  out[i] = x[i] @ W[type[i]]
# (single K-stacked matmul; W = concat(w_k, w_v, w_q, w_pre) -> lane-dense 4*HD bf16 output)
# ---------------------------------------------------------------------------
def _typed_linear_kernel(num_types, in_size, oh_ref, x_ref, w_ref, o_ref, xe_ref):
    x = x_ref[...]                                          # (TN, in) f32
    oh = oh_ref[...]                                        # (TN, T) f32 one-hot
    for t in range(num_types):                              # static & small: build K-stacked input
        xe_ref[:, t * in_size:(t + 1) * in_size] = x * oh[:, t:t + 1]
    o_ref[...] = jnp.dot(xe_ref[...], w_ref[...],
                         preferred_element_type=jnp.float32).astype(o_ref.dtype)


def typed_linear(x, onehot, w_stacked, out_dtype=jnp.float32, *, max_tile=1024):
    """x: (N, in) f32, onehot: (N, T) f32, w_stacked: (T*in, out) -> (N, out)."""
    N, in_size = x.shape
    T = onehot.shape[1]
    out_size = w_stacked.shape[1]
    out_bytes = 2 if out_dtype == jnp.bfloat16 else 4
    bytes_per_row = 4 * (in_size + T + T * in_size) + out_bytes * out_size
    resident = 4 * w_stacked.size
    tile = _pick_tile(N, bytes_per_row, resident, max_tile=max_tile)
    Np = _round_up(N, tile)

    out = pl.pallas_call(
        partial(_typed_linear_kernel, T, in_size),
        out_shape=jax.ShapeDtypeStruct((Np, out_size), out_dtype),
        grid=(Np // tile,),
        in_specs=[
            pl.BlockSpec((tile, T), lambda i: (i, 0)),
            pl.BlockSpec((tile, in_size), lambda i: (i, 0)),
            pl.BlockSpec((T * in_size, out_size), lambda i: (0, 0)),
        ],
        out_specs=pl.BlockSpec((tile, out_size), lambda i: (i, 0)),
        scratch_shapes=[pltpu.VMEM((tile, T * in_size), jnp.float32)],
        compiler_params=pltpu.CompilerParams(
            dimension_semantics=("parallel",), vmem_limit_bytes=_VMEM_LIMIT),
    )(_pad_rows(onehot, Np), _pad_rows(x, Np), w_stacked)
    return out[:N]


# ---------------------------------------------------------------------------
# Pallas kernel 2: per-edge attention logits + relation messages (packed lane-dense output)
#   a[e,h] = <k_src[e,h] @ (W_att[h,etype] * pri[h,etype]/sqrt_d), q_dst[e,h]>
#   m[e,h] =  v_src[e,h] @ W_msg[h, etype]
# Packed output row = [ m (HD lanes) | a (H lanes) | zero pad to 128-multiple ].
# ---------------------------------------------------------------------------
def _edge_message_kernel(num_etypes, hd, oh_ref, kv_ref, q_ref,
                         watt_ref, wmsgp_ref, hsum_ref, o_ref, xe_ref):
    oh = oh_ref[...]                                        # (TE, T) f32 one-hot(etype)
    kv = kv_ref[...].astype(jnp.float32)                    # (TE, 2*HD) = [k | v], bf16 in HBM
    q = q_ref[...].astype(jnp.float32)                      # (TE, HD)
    k = kv[:, :hd]
    v = kv[:, hd:2 * hd]
    # K-stacked relation-attention matmul (one MXU pass over all edge types).
    for t in range(num_etypes):
        xe_ref[:, t * hd:(t + 1) * hd] = k * oh[:, t:t + 1]
    kw = jnp.dot(xe_ref[...], watt_ref[...], preferred_element_type=jnp.float32)   # (TE, HD)
    # per-head <kw,q> reduction as MXU matmul; result lands at lanes [HD, HD+H) of packed out.
    a_pack = jnp.dot(kw * q, hsum_ref[...], preferred_element_type=jnp.float32)    # (TE, OUT)
    # K-stacked relation-message matmul (reuse the expansion scratch); lands at lanes [0, HD).
    for t in range(num_etypes):
        xe_ref[:, t * hd:(t + 1) * hd] = v * oh[:, t:t + 1]
    m_pack = jnp.dot(xe_ref[...], wmsgp_ref[...], preferred_element_type=jnp.float32)
    o_ref[...] = m_pack + a_pack                            # single 128-wide unmasked store


def edge_messages(kv_src, q_dst, etype_onehot, w_att, w_msg, pri, sqrt_d, *, max_tile=1024):
    E = kv_src.shape[0]
    H, T, D, _ = w_att.shape
    HD = H * D
    OUT = _round_up(HD + H, 128)

    # Trace-time prep (hoisted out of the kernel): fold pri/sqrt_d into the attention
    # weights, block-diagonalize over heads, K-stack over edge types, pad the message
    # weights / head-sum matrix to the packed lane-dense output width.
    eye_h = jnp.eye(H, dtype=jnp.float32)
    watt_scaled = w_att * (pri / sqrt_d)[:, :, None, None]                       # (H,T,D,D)
    watt_blk = jnp.einsum("htde,hg->thdge", watt_scaled, eye_h).reshape(T, HD, HD)
    wmsg_blk = jnp.einsum("htde,hg->thdge", w_msg, eye_h).reshape(T, HD, HD)
    watt_stk = watt_blk.reshape(T * HD, HD)
    wmsg_pad = jnp.zeros((T * HD, OUT), jnp.float32).at[:, :HD].set(
        wmsg_blk.reshape(T * HD, HD))
    r = jnp.arange(HD)
    hsum_pad = jnp.zeros((HD, OUT), jnp.float32).at[r, HD + r // D].set(1.0)

    bytes_per_row = 2 * 3 * HD + 4 * T + 4 * OUT + 4 * T * HD
    resident = 4 * (watt_stk.size + wmsg_pad.size + hsum_pad.size)
    tile = _pick_tile(E, bytes_per_row, resident, max_tile=max_tile)
    Ep = _round_up(E, tile)

    out = pl.pallas_call(
        partial(_edge_message_kernel, T, HD),
        out_shape=jax.ShapeDtypeStruct((Ep, OUT), jnp.float32),
        grid=(Ep // tile,),
        in_specs=[
            pl.BlockSpec((tile, T), lambda i: (i, 0)),
            pl.BlockSpec((tile, 2 * HD), lambda i: (i, 0)),
            pl.BlockSpec((tile, HD), lambda i: (i, 0)),
            pl.BlockSpec((T * HD, HD), lambda i: (0, 0)),
            pl.BlockSpec((T * HD, OUT), lambda i: (0, 0)),
            pl.BlockSpec((HD, OUT), lambda i: (0, 0)),
        ],
        out_specs=pl.BlockSpec((tile, OUT), lambda i: (i, 0)),
        scratch_shapes=[pltpu.VMEM((tile, T * HD), jnp.float32)],
        compiler_params=pltpu.CompilerParams(
            dimension_semantics=("parallel",), vmem_limit_bytes=_VMEM_LIMIT),
    )(_pad_rows(etype_onehot, Ep), _pad_rows(kv_src, Ep), _pad_rows(q_dst, Ep),
      watt_stk, wmsg_pad, hsum_pad)
    return out[:E, HD:HD + H], out[:E, :HD]                  # (a logits, messages)


# ---------------------------------------------------------------------------
# Pallas kernel 3: fused output stage
#   hm  = (lam * agg + (1-lam) * pre) * (indeg>0)            (pre sliced from packed kqvp)
#   ha  = hm @ W_a[ntype]       (K-stacked typed linear_a; dropout in eval = identity)
#   res = x @ residual_w        (or x itself when in_size == HD)
#   out = ha * alpha + res * (1 - alpha)   with alpha = sigmoid(skip[ntype])
# meta = [one_hot(ntype) | alpha | indeg_gate] -> ONE narrow input stream.
# ---------------------------------------------------------------------------
def _output_kernel(num_ntypes, hd, lam, has_residual,
                   meta_ref, agg_ref, kqvp_ref, x_ref, wa_ref, *rest):
    if has_residual:
        rw_ref, o_ref, he_ref = rest
    else:
        o_ref, he_ref = rest
    T = num_ntypes
    meta = meta_ref[...]                                    # (TN, T+2) f32
    oh = meta[:, :T]
    alpha = meta[:, T:T + 1]
    gate = meta[:, T + 1:T + 2]
    agg = agg_ref[...]                                      # (TN, HD) f32
    pre = kqvp_ref[:, 3 * hd:4 * hd].astype(jnp.float32)    # pre slice of packed projection
    hm = (lam * agg + (1.0 - lam) * pre) * gate
    for t in range(T):                                      # K-stacked linear_a input
        he_ref[:, t * hd:(t + 1) * hd] = hm * oh[:, t:t + 1]
    ha = jnp.dot(he_ref[...], wa_ref[...], preferred_element_type=jnp.float32)
    if has_residual:
        res = jnp.dot(x_ref[...], rw_ref[...], preferred_element_type=jnp.float32)
    else:
        res = x_ref[...].astype(jnp.float32)
    o_ref[...] = (ha * alpha + res * (1.0 - alpha)).astype(o_ref.dtype)


def output_combine(agg, kqvp, meta, x, wa_stacked, residual_w, lam, *, max_tile=1024):
    N, HD = agg.shape
    T = meta.shape[1] - 2
    in_size = x.shape[1]
    has_res = residual_w is not None

    bytes_per_row = 4 * (T + 2) + 4 * HD + 2 * 4 * HD + 4 * in_size + 4 * HD + 4 * T * HD
    resident = 4 * (wa_stacked.size + (residual_w.size if has_res else 0))
    tile = _pick_tile(N, bytes_per_row, resident, max_tile=max_tile)
    Np = _round_up(N, tile)

    in_specs = [
        pl.BlockSpec((tile, T + 2), lambda i: (i, 0)),
        pl.BlockSpec((tile, HD), lambda i: (i, 0)),
        pl.BlockSpec((tile, 4 * HD), lambda i: (i, 0)),
        pl.BlockSpec((tile, in_size), lambda i: (i, 0)),
        pl.BlockSpec((T * HD, HD), lambda i: (0, 0)),
    ]
    args = [_pad_rows(meta, Np), _pad_rows(agg, Np), _pad_rows(kqvp, Np), _pad_rows(x, Np),
            wa_stacked]
    if has_res:
        in_specs.append(pl.BlockSpec((in_size, HD), lambda i: (0, 0)))
        args.append(residual_w)

    out = pl.pallas_call(
        partial(_output_kernel, T, HD, lam, has_res),
        out_shape=jax.ShapeDtypeStruct((Np, HD), jnp.float32),
        grid=(Np // tile,),
        in_specs=in_specs,
        out_specs=pl.BlockSpec((tile, HD), lambda i: (i, 0)),
        scratch_shapes=[pltpu.VMEM((tile, T * HD), jnp.float32)],
        compiler_params=pltpu.CompilerParams(
            dimension_semantics=("parallel",), vmem_limit_bytes=_VMEM_LIMIT),
    )(*args)
    return out[:N]


# ---------------------------------------------------------------------------
# HGTConv forward (non-block graph: x_src == x_dst == x). dropout in eval mode; use_norm=False.
# ---------------------------------------------------------------------------
def hgt_conv_forward(params, x, ntype, src, dst, etype, *, num_heads, head_size,
                     num_ntypes, num_etypes):
    N, in_size = x.shape
    E = src.shape[0]
    H, D = num_heads, head_size
    HD = H * D
    sqrt_d = math.sqrt(D)
    lam = 0.3

    onehot_n = jax.nn.one_hot(ntype, num_ntypes, dtype=jnp.float32)          # (N, T)

    # Fused typed projection; column order [k | v | q | pre] so the src-side gather (k,v)
    # is one contiguous lane slice. Output stored bf16 to halve the projection + gathered
    # edge HBM streams (all matmuls still accumulate in f32).
    w_fused = jnp.concatenate(
        [params["w_k"], params["w_v"], params["w_q"], params["w_pre"]], axis=-1)  # (T,in,4HD)
    w_fused_stk = w_fused.reshape(num_ntypes * in_size, 4 * HD)
    kqvp = typed_linear(x, onehot_n, w_fused_stk, out_dtype=jnp.bfloat16)          # (N,4HD) bf16

    # TODO(synk): edge-level row gathers stay in plain JAX (data-dependent gather); could be
    #             fused into the edge kernel via scalar-prefetch + manual DMA for large E.
    kv_src = jnp.take(kqvp[:, :2 * HD], src, axis=0)                # (E, 2HD) bf16
    q_dst = jnp.take(kqvp[:, 2 * HD:3 * HD], dst, axis=0)           # (E, HD)  bf16
    onehot_e = jax.nn.one_hot(etype, num_etypes, dtype=jnp.float32)

    a, m = edge_messages(kv_src, q_dst, onehot_e,
                         params["w_att"], params["w_msg"], params["pri"], sqrt_d)

    # edge_softmax over incoming edges of each destination node, per head.
    # TODO(synk): segment softmax / segment sums are data-dependent scatters; kept in JAX.
    a_max = jax.ops.segment_max(a, dst, num_segments=N)             # (N, H)
    a_exp = jnp.exp(a - a_max[dst])
    a_den = jax.ops.segment_sum(a_exp, dst, num_segments=N)         # (N, H)
    att = a_exp / a_den[dst]                                        # (E, H)

    m = m.reshape(E, H, D) * att[..., None]                         # (E, H, D)
    agg = jax.ops.segment_sum(m, dst, num_segments=N).reshape(N, HD)
    indeg = jax.ops.segment_sum(jnp.ones((E,), jnp.float32), dst, num_segments=N)

    alpha = jax.nn.sigmoid(params["skip"])[ntype]                   # (N,) per-node gate
    meta = jnp.concatenate(
        [onehot_n, alpha[:, None], (indeg > 0).astype(jnp.float32)[:, None]], axis=1)
    wa_stk = params["w_a"].reshape(num_ntypes * HD, HD)
    residual_w = params["residual_w"] if in_size != HD else None    # skip matmul when identity
    return output_combine(agg, kqvp, meta, x, wa_stk, residual_w, lam)


# ---------------------------------------------------------------------------
# Pure-JAX f32 reference (same math, no Pallas) for a sanity check.
# ---------------------------------------------------------------------------
def hgt_conv_reference(params, x, ntype, src, dst, etype, *, num_heads, head_size,
                       num_ntypes, num_etypes):
    N, in_size = x.shape
    E = src.shape[0]
    H, D = num_heads, head_size
    HD = H * D
    lam = 0.3

    def tl(xx, tt, w):
        return jnp.einsum("ni,nio->no", xx, w[tt])

    k = tl(x, ntype, params["w_k"]).reshape(N, H, D)
    q = tl(x, ntype, params["w_q"]).reshape(N, H, D)
    v = tl(x, ntype, params["w_v"]).reshape(N, H, D)
    k_e, q_e, v_e = k[src], q[dst], v[src]

    a_list, m_list = [], []
    for h in range(H):
        watt_e = params["w_att"][h][etype]                          # (E, D, D)
        wmsg_e = params["w_msg"][h][etype]
        kw = jnp.einsum("ed,edo->eo", k_e[:, h], watt_e)
        a_h = (kw * q_e[:, h]).sum(-1) * params["pri"][h][etype] / math.sqrt(D)
        m_h = jnp.einsum("ed,edo->eo", v_e[:, h], wmsg_e)
        a_list.append(a_h)
        m_list.append(m_h)
    a = jnp.stack(a_list, axis=1)                                   # (E, H)
    m = jnp.stack(m_list, axis=1)                                   # (E, H, D)

    a_max = jax.ops.segment_max(a, dst, num_segments=N)
    a_exp = jnp.exp(a - a_max[dst])
    a_den = jax.ops.segment_sum(a_exp, dst, num_segments=N)
    att = a_exp / a_den[dst]

    agg = jax.ops.segment_sum(m * att[..., None], dst, num_segments=N)
    indeg = jax.ops.segment_sum(jnp.ones((E,), jnp.float32), dst, num_segments=N)

    pre = tl(x, ntype, params["w_pre"]).reshape(N, H, D)
    h = lam * agg + (1 - lam) * pre
    h = jnp.where((indeg > 0)[:, None, None], h, 0.0).reshape(N, HD)
    h = tl(h, ntype, params["w_a"])

    alpha = jax.nn.sigmoid(params["skip"])[ntype][:, None]
    if in_size != HD:
        res = x @ params["residual_w"]
    else:
        res = x
    return h * alpha + res * (1.0 - alpha)


if __name__ == "__main__":
    # Small, deterministic synthetic problem.
    in_size, head_size, num_heads = 16, 8, 4          # HD = 32 != in_size -> residual_w path
    num_ntypes, num_etypes = 3, 2
    N, E = 32, 64
    HD = head_size * num_heads

    key = jax.random.PRNGKey(0)
    ks = jax.random.split(key, 12)

    def xavier(k, shape, fan_in, fan_out):
        bound = math.sqrt(6.0 / (fan_in + fan_out))
        return jax.random.uniform(k, shape, jnp.float32, -bound, bound)

    params = {
        "w_pre": xavier(ks[0], (num_ntypes, in_size, HD), in_size, HD),
        "w_k": xavier(ks[1], (num_ntypes, in_size, HD), in_size, HD),
        "w_q": xavier(ks[2], (num_ntypes, in_size, HD), in_size, HD),
        "w_v": xavier(ks[3], (num_ntypes, in_size, HD), in_size, HD),
        "w_a": xavier(ks[4], (num_ntypes, HD, HD), HD, HD),
        "w_att": xavier(ks[5], (num_heads, num_etypes, head_size, head_size),
                        head_size, head_size),
        "w_msg": xavier(ks[6], (num_heads, num_etypes, head_size, head_size),
                        head_size, head_size),
        "pri": jnp.ones((num_heads, num_etypes), jnp.float32),   # relation_pri init = ones
        "skip": jnp.ones((num_ntypes,), jnp.float32),            # skip init = ones
        "residual_w": xavier(ks[7], (in_size, HD), in_size, HD),
    }

    x = jax.random.normal(ks[8], (N, in_size), jnp.float32)
    ntype = jax.random.randint(ks[9], (N,), 0, num_ntypes, jnp.int32)
    src = jax.random.randint(ks[10], (E,), 0, N, jnp.int32)
    # every node receives at least one edge
    dst = jnp.concatenate([jnp.arange(N, dtype=jnp.int32),
                           jax.random.randint(ks[11], (E - N,), 0, N, jnp.int32)])
    etype = jax.random.randint(jax.random.fold_in(key, 99), (E,), 0, num_etypes, jnp.int32)

    cfg = dict(num_heads=num_heads, head_size=head_size,
               num_ntypes=num_ntypes, num_etypes=num_etypes)

    out = hgt_conv_forward(params, x, ntype, src, dst, etype, **cfg)
    out = jax.block_until_ready(out)

    ref = hgt_conv_reference(params, x, ntype, src, dst, etype, **cfg)
    assert out.shape == (N, HD)
    assert bool(jnp.allclose(out, ref, rtol=1e-2, atol=1e-2))

    print("KERNEL_OK")
</pallas_src>

<mosaic_0001>
module attributes {stable_mosaic.version = 11 : i64} {
  func.func @_typed_linear_kernel(%arg0: i32, %arg1: memref<16x3xf32, #tpu.memory_space<vmem>>, %arg2: memref<16x16xf32, #tpu.memory_space<vmem>>, %arg3: memref<48x128xf32, #tpu.memory_space<vmem>>, %arg4: memref<16x128xbf16, #tpu.memory_space<vmem>>, %arg5: memref<16x48xf32, #tpu.memory_space<vmem>>) attributes {dimension_semantics = [#tpu.dimension_semantics<parallel>], iteration_bounds = array<i64: 2>, scalar_prefetch = 0 : i64, scratch_operands = 1 : i64, tpu.core_type = #tpu.core_type<tc>, window_params = [{transform_indices = @transform_0, window_bounds = array<i64: 16, 3>}, {transform_indices = @transform_1, window_bounds = array<i64: 16, 16>}, {pipeline_mode = #tpu.pipeline_mode<synchronous>, transform_indices = @transform_2, window_bounds = array<i64: 48, 128>}, {transform_indices = @transform_3, window_bounds = array<i64: 16, 128>}]} {
    %c0 = arith.constant 0 : index
    %c0_0 = arith.constant 0 : index
    %0 = vector.load %arg2[%c0, %c0_0] : memref<16x16xf32, #tpu.memory_space<vmem>>, vector<16x16xf32>
    %c0_1 = arith.constant 0 : index
    %c0_2 = arith.constant 0 : index
    %1 = vector.load %arg1[%c0_1, %c0_2] : memref<16x3xf32, #tpu.memory_space<vmem>>, vector<16x3xf32>
    %2 = vector.extract_strided_slice %1 {offsets = [0, 0], sizes = [16, 1], strides = [1, 1]} : vector<16x3xf32> to vector<16x1xf32>
    %3 = vector.broadcast %2 : vector<16x1xf32> to vector<16x16xf32>
    %4 = arith.mulf %0, %3 : vector<16x16xf32>
    %c0_3 = arith.constant 0 : index
    %c0_4 = arith.constant 0 : index
    %5 = vector.load %arg5[%c0_3, %c0_4] : memref<16x48xf32, #tpu.memory_space<vmem>>, vector<16x16xf32>
    tpu.vector_store %arg5[%c0_3, %c0_4], %4 {strides = array<i32>} : memref<16x48xf32, #tpu.memory_space<vmem>>, vector<16x16xf32>,
    %6 = vector.extract_strided_slice %1 {offsets = [0, 1], sizes = [16, 1], strides = [1, 1]} : vector<16x3xf32> to vector<16x1xf32>
    %7 = vector.broadcast %6 : vector<16x1xf32> to vector<16x16xf32>
    %8 = arith.mulf %0, %7 : vector<16x16xf32>
    %c0_5 = arith.constant 0 : index
    %c16 = arith.constant 16 : index
    %9 = vector.load %arg5[%c0_5, %c16] : memref<16x48xf32, #tpu.memory_space<vmem>>, vector<16x16xf32>
    tpu.vector_store %arg5[%c0_5, %c16], %8 {strides = array<i32>} : memref<16x48xf32, #tpu.memory_space<vmem>>, vector<16x16xf32>,
    %10 = vector.extract_strided_slice %1 {offsets = [0, 2], sizes = [16, 1], strides = [1, 1]} : vector<16x3xf32> to vector<16x1xf32>
    %11 = vector.broadcast %10 : vector<16x1xf32> to vector<16x16xf32>
    %12 = arith.mulf %0, %11 : vector<16x16xf32>
    %c0_6 = arith.constant 0 : index
    %c32 = arith.constant 32 : index
    %13 = vector.load %arg5[%c0_6, %c32] : memref<16x48xf32, #tpu.memory_space<vmem>>, vector<16x16xf32>
    tpu.vector_store %arg5[%c0_6, %c32], %12 {strides = array<i32>} : memref<16x48xf32, #tpu.memory_space<vmem>>, vector<16x16xf32>,
    %c0_7 = arith.constant 0 : index
    %c0_8 = arith.constant 0 : index
    %14 = vector.load %arg5[%c0_7, %c0_8] : memref<16x48xf32, #tpu.memory_space<vmem>>, vector<16x48xf32>
    %c0_9 = arith.constant 0 : index
    %c0_10 = arith.constant 0 : index
    %15 = vector.load %arg3[%c0_9, %c0_10] : memref<48x128xf32, #tpu.memory_space<vmem>>, vector<48x128xf32>
    %cst = arith.constant dense<0.000000e+00> : vector<16x128xf32>
    %16 = tpu.matmul %14, %15, %cst {dimension_numbers = #tpu.dot_dimension_numbers<[1], [0], [0], [1], [0, 0, 1, 1], [], []>} : vector<16x48xf32>, vector<48x128xf32>, vector<16x128xf32> -> vector<16x128xf32>
    %17 = arith.truncf %16 : vector<16x128xf32> to vector<16x128xbf16>
    %c0_11 = arith.constant 0 : index
    %c0_12 = arith.constant 0 : index
    %18 = vector.load %arg4[%c0_11, %c0_12] : memref<16x128xbf16, #tpu.memory_space<vmem>>, vector<16x128xbf16>
    tpu.vector_store %arg4[%c0_11, %c0_12], %17 {strides = array<i32>} : memref<16x128xbf16, #tpu.memory_space<vmem>>, vector<16x128xbf16>,
    return
  }
  func.func @transform_0(%arg0: i32) -> (i32, i32) {
    %c0_i32 = arith.constant 0 : i32
    %c0_i32_0 = arith.constant 0 : i32
    return %arg0, %c0_i32 : i32, i32
  }
  func.func @transform_1(%arg0: i32) -> (i32, i32) {
    %c0_i32 = arith.constant 0 : i32
    %c0_i32_0 = arith.constant 0 : i32
    return %arg0, %c0_i32 : i32, i32
  }
  func.func @transform_2(%arg0: i32) -> (i32, i32) {
    %c0_i32 = arith.constant 0 : i32
    %c0_i32_0 = arith.constant 0 : i32
    %c0_i32_1 = arith.constant 0 : i32
    return %c0_i32, %c0_i32_0 : i32, i32
  }
  func.func @transform_3(%arg0: i32) -> (i32, i32) {
    %c0_i32 = arith.constant 0 : i32
    %c0_i32_0 = arith.constant 0 : i32
    return %arg0, %c0_i32 : i32, i32
  }
}

</mosaic_0001>

<bundles_post_ra>
// kernel: tpu_custom_call.1
= control target key start
LH: loop header
LB: loop body
LE: loop exit
PB: predicated region body
PF: predicated region fallthrough
CT: control target
= control target key end

     0   :  { %8 = vsyncpa [#allocation4], 0  ;;  %s755_s0 = inlined_call_operand.vmem [shape: f32[32,3], index: 0, kind: input, shape index: {}]   ;;  %s756_s1 = inlined_call_operand.vmem [shape: f32[32,16], index: 1, kind: input, shape index: {}]   ;;  %s757_s2 = inlined_call_operand.vmem [shape: f32[48,128], index: 2, kind: input, shape index: {}]   ;;  %s758_s3 = inlined_call_operand.hbm [shape: bf16[32,128], index: 3, kind: output, shape index: {}]  }
   0x1   :  { %10 = vsyncpa [#allocation4 + $0x1], 0  ;;  %s633_s12 = smov 0   ;;  %s635_s13 = smov 0  }
   0x2   :  { %s637_s14 = smov 0   ;;  %s639_s15 = smov 0  }
   0x3 LB: > { %s654_s16 = sadd.s32 4294967295, %s603_s15   ;;  %s443_s17 = sadd.s32 4294967294, %s603_s15   ;;  %s603_s15 = sphi %s639_s15, %s764_s15   ;;  %s599_s14 = sphi %s637_s14, %s763_s14   ;;  %s595_s13 = sphi %s635_s13, %s762_s13   ;;  %s591_s12 = sphi %s633_s12, %s761_s12  }
   0x4   : > { %s658_s18 = sadd.s32 1, %s603_s15   ;;  %s96_s19 = sadd.s32 1, %s599_s14 }
   0x5   : > { %s93_s20 = ssub.s32 %s603_s15, %s658_s18  ;;  %p106_p0 = scmp.ne.s32.totalorder %s599_s14, %s595_s13 }
   0x6   : > { %p94_p1 = scmp.eq.s32.totalorder %s93_s20, 0  ;;  %p107_p2 = scmp.eq.s32.totalorder %s654_s16, 1 }
   0x7   : > { %p112_p3 = scmp.ne.s32.totalorder %s595_s13, %s591_s12  ;;  %p113_p4 = scmp.eq.s32.totalorder %s443_s17, 1 }
   0x8   : > { %s669_s21 = scalar_select %p94_p1, %s599_s14, %s96_s19  }
   0x9   : > { %p671_p5 = por %p107_p2, %p106_p0  ;;  %p675_p6 = por %p113_p4, %p112_p3 }
   0xa   : > { %p446_p7 = scmp.ge.s32.totalorder %s603_s15, 1  ;;  %p152_p8 = scmp.lt.s32.totalorder %s603_s15, 3 }
   0xc   : > { %p153_p9 = pnand %p446_p7, %p152_p8 }
   0xd   : > { %s448_s24 = sshll.u32 (!%p153_p9), %s654_s16, 1  ;;  %s608_s26 = smov (!%p153_p9), 16  }
   0xe   : > { %156 = sbr.rel (%p153_p9) target bundleno = 491 (0x1eb), region = 32  ;;  %p182_p10 = scmp.lt.s32.totalorder (!%p153_p9), %s448_s24, 3 }
   0xf   : > { %s609_s27 = smov (!%p153_p9), 32   ;;  %s463_s5 = sshll.u32 (!%p153_p9), %s654_s16, 7 }
  0x10   : > { %s610_s16 = smov (!%p153_p9), [#allocation3]  }
  0x11   : > { %s547_s11 = sshll.u32 (!%p153_p9), %s610_s16, 4  ;;  %s548_s11 = int_to_ptr.vmem [resolvable:$false] %s547_s11 }
  0x12   : > { %s549_s17 = scalar_lea.vmem (!%p153_p9), %s548_s11, 256 }
  0x13   : > { %v605_v0 = vmov 2   ;;  %v606_v1 = vmov 1   ;;  %s766_s24 = smov (!%p182_p10, %s448_s24), 3  ;;  %v607_v4 = vmov 0   ;;  %v262_v5 = vld [vmem:[%s757_s2 + $0x28] sm:$0xff]  ;;  %v261_v6 = vld [vmem:[%s757_s2 + $0x20] sm:$0xff] }
  0x14   : > { %539 = vset.pattern.permute.xlu1 %v605_v0  ;;  %538 = vset.pattern.permute.xlu0 %v606_v1  ;;  %s449_s25 = sshll.u32 %s766_s24, 3  ;;  %v260_v7 = vld [vmem:[%s757_s2 + $0x18] sm:$0xff]  ;;  %v259_v9 = vld [vmem:[%s757_s2 + $0x10] sm:$0xff]  ;;  %v258_v10 = vld [vmem:[%s757_s2 + $0x8] sm:$0xff]  ;;  %vm210_vm0 = vcmask 130048   ;;  %vm231_vm1 = vcmask 261248  }
  0x15   : > { %s185_s28 = scalar_lea.vmem %s755_s0, %s449_s25  ;;  %477 = vmatprep.subr.mxu0 %v262_v5  ;;  %s191_s8 = scalar_lea.vmem %s756_s1, %s449_s25  ;;  %v257_v15 = vld [vmem:[%s757_s2] sm:$0xff]  ;;  %vm252_vm2 = vcmask 392448   ;;  %vm263_vm3 = vcmask 392192  }
  0x16   : > { %v196_v2 = vld [vmem:[%s185_s28] sm:$0xff]  ;;  %v197_v3 = vld [vmem:[%s185_s28 + $0x8] sm:$0xff]  ;;  %478 = vmatpush3.msra.mxu0 %v262_v5  ;;  %s178_s28 = sand.u32 1, %s595_s13  }
  0x17   : > { %235 = vperm.xlu1 %539, %v196_v2   ;;  %214 = vperm.xlu0 %538, %v196_v2   ;;  %v194_v8 = vld [vmem:[%s191_s8] sm:$0xff]  ;;  %v195_v14 = vld [vmem:[%s191_s8 + $0x8] sm:$0xff]  ;;  %s447_s29 = sshll.u32 %s178_s28, 3  ;;  %s713_s8 = scalar_lea.hbm %s758_s3, %s463_s5 }
  0x18   : > { %479 = vmatprep.subr.mxu0 %v261_v6  ;;  %s180_s30 = scalar_lea.vmem [#allocation3], %s447_s29  ;;  %s715_s9 = scalar_lea.sflag [#allocation4], %s178_s28 }
  0x19   : > { %480 = vmatpush3.msra.mxu0 %v261_v6  ;;  %s369_s4 = sshll.u32 %s180_s30, 4  ;;  %s708_s4 = int_to_ptr.vmem [resolvable:$true] %s369_s4 }
  0x1a   : > { %481 = vmatprep.subr.mxu0 %v260_v7  ;;  %s543_s10 = scalar_lea.vmem %s708_s4, 128  ;;  %p550_p0 = scmp.lt.s32.totalorder %s708_s4, %s548_s11 }
  0x1b   : > { %239 = vperm.xlu1 %539, %v197_v3   ;;  %218 = vperm.xlu0 %538, %v197_v3   ;;  %p544_p11 = scmp.ne.s32.totalorder %s708_s4, %s543_s10  ;;  %p551_p1 = scmp.lt.s32.totalorder %s549_s17, %s543_s10 }
  0x1c   : > { %482 = vmatpush3.msra.mxu0 %v260_v7 }
  0x1d   : > { %483 = vmatprep.subr.mxu0 %v259_v9  ;;  %p545_p12 = pnand %p544_p11, %p671_p5  ;;  %p552_p2 = por %p551_p1, %p550_p0 }
  0x1e   : > { %484 = vmatpush3.msra.mxu0 %v259_v9 }
  0x1f   : > { %541 = vset.pattern.permute.xlu1 %v607_v4  ;;  %540 = vset.pattern.permute.xlu0 %v607_v4  ;;  %p546_p13 = pneg %p545_p12 }
  0x20   : > { %205 = vperm.xlu1 %541, %v197_v3   ;;  %200 = vperm.xlu0 %540, %v196_v2  }
  0x21   : > { %485 = vmatprep.subr.mxu0 %v258_v10  ;;  %p553_p3 = pnand %p552_p2, %p546_p13 }
  0x22   : > { %486 = vmatpush3.msra.mxu0 %v258_v10 }
  0x23   : > { %487 = vmatprep.subr.mxu0 %v257_v15 }
  0x24   : > { %542 = vset.pattern.permute.xlu0 %v605_v0  ;;  %488 = vmatpush3.msra.mxu0 %v257_v15 }
  0x92   : > { %v236_v11 = vpop.permute.xlu1 %235  ;;  %v215_v12 = vpop.permute.xlu0 %214 }
  0x93   : > { %v221_v13 = vmul.f32 %v215_v12, %v194_v8  ;;  %v242_v16 = vmul.f32 %v236_v11, %v194_v8 }
  0x95   : > { %225 = vrot.lane.b32.xlu1 %v221_v13, %s608_s26 }
  0x96   : > { %v219_v17 = vpop.permute.xlu0 %218  ;;  %v240_v18 = vpop.permute.xlu1 %239 }
  0x97   : > { %v222_v19 = vmul.f32 %v219_v17, %v195_v14  ;;  %v243_v20 = vmul.f32 %v240_v18, %v195_v14 }
  0x99   : > { %246 = vrot.lane.b32.xlu1 %v242_v16, %s609_s27  ;;  %227 = vrot.lane.b32.xlu0 %v222_v19, %s608_s26 }
  0x9b   : > { %v206_v21 = vpop.permute.xlu1 %205  ;;  %v201_v22 = vpop.permute.xlu0 %200 }
  0x9c   : > { %v209_v23 = vmul.f32 %v206_v21, %v195_v14  ;;  %v208_v24 = vmul.f32 %v201_v22, %v194_v8 }
  0x9d   : > { %248 = vrot.lane.b32.xlu0 %v243_v20, %s609_s27 }
  0x9e   : > { %212 = vst.msk [vmem:[#allocation2 + $0x8] sm:$0xff] %vm210_vm0, %v209_v23  ;;  %211 = vst.msk [vmem:[#allocation2] sm:$0xff] %vm210_vm0, %v208_v24 }
 0x107   : > { %v226_v25 = vpop.permute.xlu1 %225 }
 0x108   : > { %232 = vst.msk [vmem:[#allocation2] sm:$0xff] %vm231_vm1, %v226_v25 }
 0x10b   : > { %v247_v26 = vpop.permute.xlu1 %246  ;;  %v228_v27 = vpop.permute.xlu0 %227 }
 0x10c   : > { %253 = vst.msk [vmem:[#allocation2] sm:$0xff] %vm252_vm2, %v247_v26 }
 0x10d   : > { %233 = vst.msk [vmem:[#allocation2 + $0x8] sm:$0xff] %vm231_vm1, %v228_v27 }
 0x10f   : > { %v249_v28 = vpop.permute.xlu0 %248 }
 0x110   : > { %254 = vst.msk [vmem:[#allocation2 + $0x8] sm:$0xff] %vm252_vm2, %v249_v28 }
 0x113   : > { %v255_v29 = vld [vmem:[#allocation2] sm:$0xff] }
 0x114   : > { %489 = vmatprep.mubr.msk.f32.mxu0 %vm263_vm3, %v255_v29 }
 0x117   : > { %v256_v30 = vld [vmem:[#allocation2 + $0x8] sm:$0xff] }
 0x118   : > { %490 = vmatmul.mubr.msk.f32.vlgmr.msra.gmra.mxu0 %vm263_vm3, %v256_v30 }
 0x1d8   : > { %v491_v31 = vpop.f32.mrf.mxu0 }
 0x1da   : > { %v336_v32 = vpop.f32.mrf.mxu0 }
 0x1db   : > { %v467_v33 = vpack.c.bf16 %v491_v31, %v336_v32 }
 0x1dd   : > { %468 = vst [vmem:[%s180_s30] sm:$0xff] %v467_v33  }
 0x1de   : > { %556 = shalt.err (!%p553_p3)
}
 0x1df   : > { %s557_s19 = scalar_lea.hbm %s713_s8, 128  ;;  %s561_s25 = scalar_lea.hbm %s758_s3, 256 }
 0x1e0   : > { %p558_p4 = scmp.ne.s32.totalorder %s713_s8, %s557_s19  ;;  %p562_p9 = scmp.lt.s32.totalorder %s713_s8, %s758_s3 }
 0x1e1   : > { %p563_p10 = scmp.lt.s32.totalorder %s561_s25, %s557_s19 }
 0x1e2   : > { %p559_p7 = pnand %p558_p4, %p671_p5 }
 0x1e3   : > { %p564_p11 = por %p563_p10, %p562_p9 }
 0x1e4   : > { %p560_p8 = pneg %p559_p7 }
 0x1e6   : > { %p565_p12 = pnand %p564_p11, %p560_p8 }
 0x1e8   : > { %568 = shalt.err (!%p565_p12)
}
 0x1e9   : > { %s611_s28 = smov 64   ;;  %s612_s29 = smov 4  }
 0x1ea   : > { %492 = dma.vmem_to_hbm [thread:$0]  (%p671_p5), %s708_s4, 128, %s713_s8, %s715_s9, %s611_s28, %s611_s28, %s612_s29  }
 0x1eb PF: > { %p498_p13 = scmp.ge.s32.totalorder %s603_s15, 2  ;;  %s384_s30 = sand.u32 1, %s591_s12  }
 0x1ec   : > { %s385_s5 = scalar_lea.sflag [#allocation4], %s384_s30 }
 0x1ed   : > { %p495_p0 = pnand %p498_p13, %p675_p6 }
 0x1ef   : > { %p496_p1 = pneg %p495_p0 }
 0x1f1   : > { %586 = dma.done.wait (%p496_p1), %s385_s5, 128  }
 0x1f2   : > { %588 = vsyncadd (%p496_p1), %s385_s5, 4294967168  ;;  %p13_p2 = scmp.ge.s32.totalorder %s658_s18, 4   ;;  %s761_s12 = smov %s595_s13 }
 0x1f3   : > { %s762_s13 = smov %s599_s14  ;;  %s763_s14 = smov %s669_s21 }
 0x1f4   : > { %s764_s15 = smov %s658_s18  ;;  %15 = sbr.rel (!%p13_p2) target bundleno = 3 (0x3), region = 70 }
 0x1f9   :  { %390 = vsyncpa [#allocation4], 1 }
 0x1fa   :  { %392 = vsyncpa [#allocation4 + $0x1], 1 }

</bundles_post_ra>
